<compile_context>
chip_gen: v7x
topology: tpu7x:2x2x1
jax: 0.10.0
libtpu: 0.0.40
codegen_flags: <defaults>
</compile_context>

<pallas_src>
import functools

import numpy as np
import jax
import jax.numpy as jnp
from jax.experimental import pallas as pl
from jax.experimental.pallas import tpu as pltpu


def _round_up(x, m):
    return (x + m - 1) // m * m


# ---------------------------------------------------------------------------
# Kernel 1: fused conv-as-matmul + bias + ReLU + p*p maxpool
#   cols rows are grouped as (pool_offset q, n, hp, wp); each q-group is `chunk`
#   rows (sublane aligned).  Pool = max over the n_off row-groups of the matmul
#   result; ReLU applied in the same epilogue.
# ---------------------------------------------------------------------------
def _conv_pool_kernel(cols_ref, w_ref, b_ref, o_ref, *, n_off, chunk):
    y = jnp.dot(cols_ref[...], w_ref[...], preferred_element_type=jnp.float32)
    y = jnp.maximum(y + b_ref[...], 0.0)            # bias + ReLU (relu∘max == max∘relu)
    m = y[0:chunk, :]
    for q in range(1, n_off):                       # 8-aligned static slices -> cheap VPU max
        m = jnp.maximum(m, y[q * chunk:(q + 1) * chunk, :])
    o_ref[...] = m


def conv_pool_relu(cols, w_mat, b_row, *, n_off, chunk, c_pad):
    """cols:(n_off*chunk, K) bf16; w_mat:(K, c_pad) bf16; b_row:(1, c_pad) f32.
    Returns (chunk, c_pad) f32: relu(maxpool(conv+bias)), rows ordered (n, hp, wp)."""
    M, K = cols.shape
    return pl.pallas_call(
        functools.partial(_conv_pool_kernel, n_off=n_off, chunk=chunk),
        grid=(1,),
        in_specs=[
            pl.BlockSpec((M, K), lambda i: (0, 0)),
            pl.BlockSpec((K, c_pad), lambda i: (0, 0)),
            pl.BlockSpec((1, c_pad), lambda i: (0, 0)),
        ],
        out_specs=pl.BlockSpec((chunk, c_pad), lambda i: (0, 0)),
        out_shape=jax.ShapeDtypeStruct((chunk, c_pad), jnp.float32),
        compiler_params=pltpu.CompilerParams(dimension_semantics=("arbitrary",)),
    )(cols, w_mat, b_row)


# ---------------------------------------------------------------------------
# Kernel 2: fused Linear stack (Linear -> ReLU -> ... -> Linear) in one call
# ---------------------------------------------------------------------------
def _mlp_kernel(*refs, num_layers):
    x_ref, o_ref = refs[0], refs[-1]
    h = x_ref[...]                                   # bf16
    for layer in range(num_layers):
        w = refs[1 + 2 * layer][...]                 # bf16
        b = refs[2 + 2 * layer][...]                 # f32
        h = jnp.dot(h, w, preferred_element_type=jnp.float32) + b
        if layer < num_layers - 1:
            h = jnp.maximum(h, 0.0).astype(jnp.bfloat16)
    o_ref[...] = h                                   # f32, lane-dense


def mlp_fused(feats, w_mats, biases):
    """feats:(B,F0) f32; w_mats[l]:(F_l, F_{l+1}); biases[l]:(F_{l+1},).
    ReLU between layers, none after the last. Returns (B, F_last) f32."""
    B, F0 = feats.shape
    nl = len(w_mats)
    Bp = _round_up(B, 8)
    # Input feature dim stays un-padded (full-array block is legal); hidden/output
    # feature dims are lane-padded to 128 so intermediates / output are lane-dense.
    k_dims = [F0] + [_round_up(w.shape[1], 128) for w in w_mats]

    x_p = jnp.pad(feats, ((0, Bp - B), (0, 0))).astype(jnp.bfloat16)
    args = [x_p]
    in_specs = [pl.BlockSpec((Bp, F0), lambda i: (0, 0))]
    for l, (w, b) in enumerate(zip(w_mats, biases)):
        fin, fout = w.shape
        kin, kout = k_dims[l], k_dims[l + 1]
        w_p = jnp.pad(w.astype(jnp.float32),
                      ((0, kin - fin), (0, kout - fout))).astype(jnp.bfloat16)
        b_p = jnp.pad(b.astype(jnp.float32), (0, kout - fout)).reshape(1, kout)
        args += [w_p, b_p]
        in_specs += [
            pl.BlockSpec((kin, kout), lambda i: (0, 0)),
            pl.BlockSpec((1, kout), lambda i: (0, 0)),
        ]

    out = pl.pallas_call(
        functools.partial(_mlp_kernel, num_layers=nl),
        grid=(1,),
        in_specs=in_specs,
        out_specs=pl.BlockSpec((Bp, k_dims[-1]), lambda i: (0, 0)),
        out_shape=jax.ShapeDtypeStruct((Bp, k_dims[-1]), jnp.float32),
        compiler_params=pltpu.CompilerParams(dimension_semantics=("parallel",)),
    )(*args)
    return out[:B, :w_mats[-1].shape[1]]


# ---------------------------------------------------------------------------
# Plain-JAX glue (layout only; all FLOPs run inside the kernels above)
# ---------------------------------------------------------------------------
def im2col_pooled_nhwc(x, kh, kw, p):
    """x:(N,H,W,C) -> cols:(p*p, N*Hp*Wp, kh*kw*C); rows grouped by pool offset (i,j),
    rows within a group ordered (n, hp, wp); columns ordered (dy, dx, c)."""
    N, H, W, C = x.shape
    Ho, Wo = H - kh + 1, W - kw + 1
    Hp, Wp = Ho // p, Wo // p                        # PyTorch MaxPool2d floor behaviour
    patches = jnp.concatenate(
        [x[:, dy:dy + Ho, dx:dx + Wo, :] for dy in range(kh) for dx in range(kw)],
        axis=-1)                                     # (N, Ho, Wo, kh*kw*C)
    patches = patches[:, :Hp * p, :Wp * p, :]
    pc = patches.reshape(N, Hp, p, Wp, p, kh * kw * C).transpose(2, 4, 0, 1, 3, 5)
    return pc.reshape(p * p, N * Hp * Wp, kh * kw * C), Hp, Wp


def conv_weight_matrix(w, c_pad):
    """w:(Cout,Cin,kh,kw) OIHW -> (kh*kw*Cin, c_pad) bf16, rows ordered (dy, dx, c)."""
    cout, cin, kh, kw = w.shape
    wt = jnp.transpose(w, (2, 3, 1, 0)).reshape(kh * kw * cin, cout)
    return jnp.pad(wt, ((0, 0), (0, c_pad - cout))).astype(jnp.bfloat16)


def linear_weight_for_nhwc_flatten(w, c, hp, wp):
    """w:(Fout, c*hp*wp) with columns ordered (c,h,w) [PyTorch NCHW flatten]
    -> (hp*wp*c, Fout) matching the de-padded NHWC (h,w,c) flatten."""
    fout = w.shape[0]
    wt = w.reshape(fout, c, hp, wp).transpose(0, 2, 3, 1)
    return wt.reshape(fout, hp * wp * c).T


def cnn_forward(x_nchw, conv_params, pools, linear_params):
    N = x_nchw.shape[0]
    x = jnp.transpose(x_nchw, (0, 2, 3, 1))          # NHWC once, up front
    hp = wp = None
    for (w, b), p in zip(conv_params, pools):
        cout, cin, kh, kw = w.shape
        c_pad = _round_up(cout, 128)                 # lane-dense conv-matmul output
        cols3, Hp, Wp = im2col_pooled_nhwc(x, kh, kw, p)
        rows = N * Hp * Wp
        chunk = _round_up(rows, 8)                   # sublane-aligned pool groups
        cols = jnp.pad(cols3, ((0, 0), (0, chunk - rows), (0, 0)))
        cols = cols.reshape(p * p * chunk, kh * kw * cin).astype(jnp.bfloat16)
        w_mat = conv_weight_matrix(w, c_pad)
        b_row = jnp.pad(b.astype(jnp.float32), (0, c_pad - cout)).reshape(1, c_pad)
        pooled = conv_pool_relu(cols, w_mat, b_row,
                                n_off=p * p, chunk=chunk, c_pad=c_pad)
        # De-pad rows AND channels before anything downstream sees them.
        x = pooled[:rows, :cout].reshape(N, Hp, Wp, cout)
        hp, wp = Hp, Wp

    if conv_params:
        c = x.shape[-1]
        feats = x.reshape(N, hp * wp * c)            # K = hp*wp*c (e.g. 392), not 6272
        w0, b0 = linear_params[0]
        w_mats = [linear_weight_for_nhwc_flatten(w0, c, hp, wp)]
    else:
        feats = x_nchw.reshape(N, -1)
        w0, b0 = linear_params[0]
        w_mats = [w0.T]
    biases = [b0]
    for (w, b) in linear_params[1:]:
        w_mats.append(w.T)
        biases.append(b)
    return mlp_fused(feats, w_mats, biases)


# ---------------------------------------------------------------------------
# Deterministic parameter init (PyTorch-style U(-1/sqrt(fan_in), 1/sqrt(fan_in)))
# ---------------------------------------------------------------------------
def init_params(key, conv2d_shapes, linear_shapes):
    conv_params, linear_params = [], []
    for (cin, cout, k) in conv2d_shapes:
        key, k1, k2 = jax.random.split(key, 3)
        bound = 1.0 / np.sqrt(cin * k * k)
        w = jax.random.uniform(k1, (cout, cin, k, k), jnp.float32, -bound, bound)
        b = jax.random.uniform(k2, (cout,), jnp.float32, -bound, bound)
        conv_params.append((w, b))
    for (fin, fout) in linear_shapes:
        key, k1, k2 = jax.random.split(key, 3)
        bound = 1.0 / np.sqrt(fin)
        w = jax.random.uniform(k1, (fout, fin), jnp.float32, -bound, bound)
        b = jax.random.uniform(k2, (fout,), jnp.float32, -bound, bound)
        linear_params.append((w, b))
    return conv_params, linear_params


# ---------------------------------------------------------------------------
# Pure-JAX reference (semantics check against the PyTorch forward)
# ---------------------------------------------------------------------------
def ref_forward(x, conv_params, pools, linear_params):
    for (w, b), p in zip(conv_params, pools):
        x = jax.lax.conv_general_dilated(
            x, w, window_strides=(1, 1), padding='VALID',
            dimension_numbers=('NCHW', 'OIHW', 'NCHW'),
            precision=jax.lax.Precision.HIGHEST) + b[None, :, None, None]
        x = jax.lax.reduce_window(x, -jnp.inf, jax.lax.max,
                                  (1, 1, p, p), (1, 1, p, p), 'VALID')
        x = jnp.maximum(x, 0.0)
    x = x.reshape(x.shape[0], -1)
    for i, (w, b) in enumerate(linear_params):
        x = jnp.dot(x, w.T, precision=jax.lax.Precision.HIGHEST) + b
        if i < len(linear_params) - 1:
            x = jnp.maximum(x, 0.0)
    return x


if __name__ == "__main__":
    # Shapes consistent with the module:
    #   shape_in = (4, 16, 16), batch = 2
    #   conv2d_shapes    = [(4, 8, 3)]   -> conv 4->8 ch, k=3  => 14x14
    #   maxpool2d_shapes = [(2,)]        -> pool 2             => 7x7
    #   linear_shapes    = [(8*7*7, 32), (32, 10)]
    #   activation_function = ReLU
    batch, cin, H, W = 2, 4, 16, 16
    conv2d_shapes = [(4, 8, 3)]
    maxpool2d_shapes = [(2,)]
    linear_shapes = [(8 * 7 * 7, 32), (32, 10)]
    pools = [m[0] for m in maxpool2d_shapes]

    key = jax.random.PRNGKey(0)
    kx, kp = jax.random.split(key)
    x = jax.random.normal(kx, (batch, cin, H, W), dtype=jnp.float32)
    conv_params, linear_params = init_params(kp, conv2d_shapes, linear_shapes)

    fwd = jax.jit(lambda xin: cnn_forward(xin, conv_params, pools, linear_params))
    out = jax.block_until_ready(fwd(x))
    assert out.shape == (batch, linear_shapes[-1][1])

    ref = ref_forward(x, conv_params, pools, linear_params)
    # bf16 MXU operands with f32 accumulation vs f32 HIGHEST-precision reference
    np.testing.assert_allclose(np.asarray(out), np.asarray(ref), rtol=2e-2, atol=2e-2)

    print("KERNEL_OK")
</pallas_src>

<mosaic_0001>
module attributes {stable_mosaic.version = 11 : i64} {
  func.func @_conv_pool_kernel(%arg0: i32, %arg1: memref<416x36xbf16, #tpu.memory_space<vmem>>, %arg2: memref<36x128xbf16, #tpu.memory_space<vmem>>, %arg3: memref<1x128xf32, #tpu.memory_space<vmem>>, %arg4: memref<104x128xf32, #tpu.memory_space<vmem>>) attributes {dimension_semantics = [#tpu.dimension_semantics<arbitrary>], iteration_bounds = array<i64: 1>, scalar_prefetch = 0 : i64, scratch_operands = 0 : i64, tpu.core_type = #tpu.core_type<tc>, window_params = [{pipeline_mode = #tpu.pipeline_mode<synchronous>, transform_indices = @transform_0, window_bounds = array<i64: 416, 36>}, {pipeline_mode = #tpu.pipeline_mode<synchronous>, transform_indices = @transform_1, window_bounds = array<i64: 36, 128>}, {pipeline_mode = #tpu.pipeline_mode<synchronous>, transform_indices = @transform_2, window_bounds = array<i64: 1, 128>}, {pipeline_mode = #tpu.pipeline_mode<synchronous>, transform_indices = @transform_3, window_bounds = array<i64: 104, 128>}]} {
    %c0 = arith.constant 0 : index
    %c0_0 = arith.constant 0 : index
    %0 = vector.load %arg1[%c0, %c0_0] : memref<416x36xbf16, #tpu.memory_space<vmem>>, vector<416x36xbf16>
    %c0_1 = arith.constant 0 : index
    %c0_2 = arith.constant 0 : index
    %1 = vector.load %arg2[%c0_1, %c0_2] : memref<36x128xbf16, #tpu.memory_space<vmem>>, vector<36x128xbf16>
    %cst = arith.constant dense<0.000000e+00> : vector<416x128xf32>
    %2 = tpu.matmul %0, %1, %cst {dimension_numbers = #tpu.dot_dimension_numbers<[1], [0], [0], [1], [0, 0, 1, 1], [], []>} : vector<416x36xbf16>, vector<36x128xbf16>, vector<416x128xf32> -> vector<416x128xf32>
    %c0_3 = arith.constant 0 : index
    %c0_4 = arith.constant 0 : index
    %3 = vector.load %arg3[%c0_3, %c0_4] : memref<1x128xf32, #tpu.memory_space<vmem>>, vector<1x128xf32>
    %4 = vector.broadcast %3 : vector<1x128xf32> to vector<416x128xf32>
    %5 = arith.addf %2, %4 : vector<416x128xf32>
    %cst_5 = arith.constant 0.000000e+00 : f32
    %6 = vector.broadcast %cst_5 : f32 to vector<416x128xf32>
    %7 = arith.maximumf %5, %6 : vector<416x128xf32>
    %8 = vector.extract_strided_slice %7 {offsets = [0, 0], sizes = [104, 128], strides = [1, 1]} : vector<416x128xf32> to vector<104x128xf32>
    %9 = vector.extract_strided_slice %7 {offsets = [104, 0], sizes = [104, 128], strides = [1, 1]} : vector<416x128xf32> to vector<104x128xf32>
    %10 = arith.maximumf %8, %9 : vector<104x128xf32>
    %11 = vector.extract_strided_slice %7 {offsets = [208, 0], sizes = [104, 128], strides = [1, 1]} : vector<416x128xf32> to vector<104x128xf32>
    %12 = arith.maximumf %10, %11 : vector<104x128xf32>
    %13 = vector.extract_strided_slice %7 {offsets = [312, 0], sizes = [104, 128], strides = [1, 1]} : vector<416x128xf32> to vector<104x128xf32>
    %14 = arith.maximumf %12, %13 : vector<104x128xf32>
    %c0_6 = arith.constant 0 : index
    %c0_7 = arith.constant 0 : index
    %15 = vector.load %arg4[%c0_6, %c0_7] : memref<104x128xf32, #tpu.memory_space<vmem>>, vector<104x128xf32>
    tpu.vector_store %arg4[%c0_6, %c0_7], %14 {strides = array<i32>} : memref<104x128xf32, #tpu.memory_space<vmem>>, vector<104x128xf32>,
    return
  }
  func.func @transform_0(%arg0: i32) -> (i32, i32) {
    %c0_i32 = arith.constant 0 : i32
    %c0_i32_0 = arith.constant 0 : i32
    %c0_i32_1 = arith.constant 0 : i32
    return %c0_i32, %c0_i32_0 : i32, i32
  }
  func.func @transform_1(%arg0: i32) -> (i32, i32) {
    %c0_i32 = arith.constant 0 : i32
    %c0_i32_0 = arith.constant 0 : i32
    %c0_i32_1 = arith.constant 0 : i32
    return %c0_i32, %c0_i32_0 : i32, i32
  }
  func.func @transform_2(%arg0: i32) -> (i32, i32) {
    %c0_i32 = arith.constant 0 : i32
    %c0_i32_0 = arith.constant 0 : i32
    %c0_i32_1 = arith.constant 0 : i32
    return %c0_i32, %c0_i32_0 : i32, i32
  }
  func.func @transform_3(%arg0: i32) -> (i32, i32) {
    %c0_i32 = arith.constant 0 : i32
    %c0_i32_0 = arith.constant 0 : i32
    %c0_i32_1 = arith.constant 0 : i32
    return %c0_i32, %c0_i32_0 : i32, i32
  }
}

module attributes {stable_mosaic.version = 11 : i64} {
  func.func @_mlp_kernel(%arg0: i32, %arg1: memref<8x392xbf16, #tpu.memory_space<vmem>>, %arg2: memref<392x128xbf16, #tpu.memory_space<vmem>>, %arg3: memref<1x128xf32, #tpu.memory_space<vmem>>, %arg4: memref<128x128xbf16, #tpu.memory_space<vmem>>, %arg5: memref<1x128xf32, #tpu.memory_space<vmem>>, %arg6: memref<8x128xf32, #tpu.memory_space<vmem>>) attributes {dimension_semantics = [#tpu.dimension_semantics<parallel>], iteration_bounds = array<i64: 1>, scalar_prefetch = 0 : i64, scratch_operands = 0 : i64, tpu.core_type = #tpu.core_type<tc>, window_params = [{pipeline_mode = #tpu.pipeline_mode<synchronous>, transform_indices = @transform_0, window_bounds = array<i64: 8, 392>}, {pipeline_mode = #tpu.pipeline_mode<synchronous>, transform_indices = @transform_1, window_bounds = array<i64: 392, 128>}, {pipeline_mode = #tpu.pipeline_mode<synchronous>, transform_indices = @transform_2, window_bounds = array<i64: 1, 128>}, {pipeline_mode = #tpu.pipeline_mode<synchronous>, transform_indices = @transform_3, window_bounds = array<i64: 128, 128>}, {pipeline_mode = #tpu.pipeline_mode<synchronous>, transform_indices = @transform_4, window_bounds = array<i64: 1, 128>}, {pipeline_mode = #tpu.pipeline_mode<synchronous>, transform_indices = @transform_5, window_bounds = array<i64: 8, 128>}]} {
    %c0 = arith.constant 0 : index
    %c0_0 = arith.constant 0 : index
    %0 = vector.load %arg1[%c0, %c0_0] : memref<8x392xbf16, #tpu.memory_space<vmem>>, vector<8x392xbf16>
    %c0_1 = arith.constant 0 : index
    %c0_2 = arith.constant 0 : index
    %1 = vector.load %arg2[%c0_1, %c0_2] : memref<392x128xbf16, #tpu.memory_space<vmem>>, vector<392x128xbf16>
    %c0_3 = arith.constant 0 : index
    %c0_4 = arith.constant 0 : index
    %2 = vector.load %arg3[%c0_3, %c0_4] : memref<1x128xf32, #tpu.memory_space<vmem>>, vector<1x128xf32>
    %cst = arith.constant dense<0.000000e+00> : vector<8x128xf32>
    %3 = tpu.matmul %0, %1, %cst {dimension_numbers = #tpu.dot_dimension_numbers<[1], [0], [0], [1], [0, 0, 1, 1], [], []>} : vector<8x392xbf16>, vector<392x128xbf16>, vector<8x128xf32> -> vector<8x128xf32>
    %4 = vector.broadcast %2 : vector<1x128xf32> to vector<8x128xf32>
    %5 = arith.addf %3, %4 : vector<8x128xf32>
    %cst_5 = arith.constant 0.000000e+00 : f32
    %6 = vector.broadcast %cst_5 : f32 to vector<8x128xf32>
    %7 = arith.maximumf %5, %6 : vector<8x128xf32>
    %8 = arith.truncf %7 : vector<8x128xf32> to vector<8x128xbf16>
    %c0_6 = arith.constant 0 : index
    %c0_7 = arith.constant 0 : index
    %9 = vector.load %arg4[%c0_6, %c0_7] : memref<128x128xbf16, #tpu.memory_space<vmem>>, vector<128x128xbf16>
    %c0_8 = arith.constant 0 : index
    %c0_9 = arith.constant 0 : index
    %10 = vector.load %arg5[%c0_8, %c0_9] : memref<1x128xf32, #tpu.memory_space<vmem>>, vector<1x128xf32>
    %cst_10 = arith.constant dense<0.000000e+00> : vector<8x128xf32>
    %11 = tpu.matmul %8, %9, %cst_10 {dimension_numbers = #tpu.dot_dimension_numbers<[1], [0], [0], [1], [0, 0, 1, 1], [], []>} : vector<8x128xbf16>, vector<128x128xbf16>, vector<8x128xf32> -> vector<8x128xf32>
    %12 = vector.broadcast %10 : vector<1x128xf32> to vector<8x128xf32>
    %13 = arith.addf %11, %12 : vector<8x128xf32>
    %c0_11 = arith.constant 0 : index
    %c0_12 = arith.constant 0 : index
    %14 = vector.load %arg6[%c0_11, %c0_12] : memref<8x128xf32, #tpu.memory_space<vmem>>, vector<8x128xf32>
    tpu.vector_store %arg6[%c0_11, %c0_12], %13 {strides = array<i32>} : memref<8x128xf32, #tpu.memory_space<vmem>>, vector<8x128xf32>,
    return
  }
  func.func @transform_0(%arg0: i32) -> (i32, i32) {
    %c0_i32 = arith.constant 0 : i32
    %c0_i32_0 = arith.constant 0 : i32
    %c0_i32_1 = arith.constant 0 : i32
    return %c0_i32, %c0_i32_0 : i32, i32
  }
  func.func @transform_1(%arg0: i32) -> (i32, i32) {
    %c0_i32 = arith.constant 0 : i32
    %c0_i32_0 = arith.constant 0 : i32
    %c0_i32_1 = arith.constant 0 : i32
    return %c0_i32, %c0_i32_0 : i32, i32
  }
  func.func @transform_2(%arg0: i32) -> (i32, i32) {
    %c0_i32 = arith.constant 0 : i32
    %c0_i32_0 = arith.constant 0 : i32
    %c0_i32_1 = arith.constant 0 : i32
    return %c0_i32, %c0_i32_0 : i32, i32
  }
  func.func @transform_3(%arg0: i32) -> (i32, i32) {
    %c0_i32 = arith.constant 0 : i32
    %c0_i32_0 = arith.constant 0 : i32
    %c0_i32_1 = arith.constant 0 : i32
    return %c0_i32, %c0_i32_0 : i32, i32
  }
  func.func @transform_4(%arg0: i32) -> (i32, i32) {
    %c0_i32 = arith.constant 0 : i32
    %c0_i32_0 = arith.constant 0 : i32
    %c0_i32_1 = arith.constant 0 : i32
    return %c0_i32, %c0_i32_0 : i32, i32
  }
  func.func @transform_5(%arg0: i32) -> (i32, i32) {
    %c0_i32 = arith.constant 0 : i32
    %c0_i32_0 = arith.constant 0 : i32
    %c0_i32_1 = arith.constant 0 : i32
    return %c0_i32, %c0_i32_0 : i32, i32
  }
}

</mosaic_0001>

<bundles_post_ra>
// kernel: _lambda_.2
= control target key start
LH: loop header
LB: loop body
LE: loop exit
PB: predicated region body
PF: predicated region fallthrough
CT: control target
= control target key end

     0   :  { %vm224_vm0 = vcmask 293888   ;;  %vm303_vm1 = vcmask 1041408   ;;  %s1159_s1 = inlined_call_operand.vmem [shape: bf16[36,128], index: 1, kind: input, shape index: {}]   ;;  %s1160_s0 = inlined_call_operand.vmem [shape: bf16[416,36], index: 0, kind: input, shape index: {}]   ;;  %s1161_s2 = inlined_call_operand.vmem [shape: f32[1,128], index: 2, kind: input, shape index: {}]   ;;  %s1162_s3 = inlined_call_operand.vmem [shape: f32[104,128], index: 3, kind: output, shape index: {}]  }
   0x1   :  { %v807_v0 = vld [vmem:[%s1159_s1] sm:$0xff]   ;;  %v808_v1 = vld [vmem:[%s1159_s1 + $0x8] sm:$0xff]   ;;  %v809_v2 = vld [vmem:[%s1159_s1 + $0x10] ss:$0 sps:$4 sm:$0x33]  }
   0x2   :  { %741 = vmatprep.subr.bf16.mxu0 %v807_v0  ;;  %799 = vmatprep.subr.bf16.mxu1 %v807_v0  ;;  %v810_v3 = vld [vmem:[%s1160_s0] sm:$0xff]   ;;  %v812_v4 = vld [vmem:[%s1160_s0 + $0x70] sm:$0xff]   ;;  %v305_v5 = vsel %vm303_vm1, %v809_v2, 0  ;;  %v811_v6 = vld [vmem:[%s1160_s0 + $0x8] sm:$0xff]  }
   0x3   :  { %742 = vmatpush3.bf16.msra.mxu0 %v807_v0  ;;  %802 = vmatpush3.bf16.msra.mxu1 %v807_v0  ;;  %v813_v7 = vld [vmem:[%s1160_s0 + $0x78] sm:$0xff]   ;;  %v814_v8 = vld [vmem:[%s1160_s0 + $0x10] sm:$0xff]   ;;  %v816_v9 = vld [vmem:[%s1160_s0 + $0x80] sm:$0xff]  }
   0x4   :  { %743 = vmatprep.subr.bf16.mxu0 %v808_v1  ;;  %800 = vmatprep.subr.bf16.mxu1 %v808_v1  ;;  %v815_v10 = vld [vmem:[%s1160_s0 + $0x18] sm:$0xff]   ;;  %v817_v11 = vld [vmem:[%s1160_s0 + $0x88] sm:$0xff]   ;;  %v818_v12 = vld [vmem:[%s1160_s0 + $0x20] sm:$0xff]  }
   0x5   :  { %747 = vmatprep.mubr.msk.bf16.mxu0 %vm224_vm0, %v810_v3  ;;  %775 = vmatprep.mubr.msk.bf16.mxu1 %vm224_vm0, %v812_v4  ;;  %v820_v13 = vld [vmem:[%s1160_s0 + $0x90] sm:$0xff]   ;;  %v819_v14 = vld [vmem:[%s1160_s0 + $0x28] sm:$0xff]   ;;  %v821_v15 = vld [vmem:[%s1160_s0 + $0x98] sm:$0xff]  }
   0x6   :  { %v822_v16 = vld [vmem:[%s1160_s0 + $0x30] sm:$0xff]   ;;  %v824_v17 = vld [vmem:[%s1160_s0 + $0xa0] sm:$0xff]   ;;  %v823_v18 = vld [vmem:[%s1160_s0 + $0x38] sm:$0xff]  }
   0x7   :  { %744 = vmatpush3.bf16.msra.mxu0 %v808_v1  ;;  %803 = vmatpush3.bf16.msra.mxu1 %v808_v1  ;;  %v825_v19 = vld [vmem:[%s1160_s0 + $0xa8] sm:$0xff]   ;;  %v826_v20 = vld [vmem:[%s1160_s0 + $0x40] sm:$0xff]   ;;  %v828_v21 = vld [vmem:[%s1160_s0 + $0xb0] sm:$0xff]  }
   0x8   :  { %805 = vmatprep.subr.msk.bf16.mxu0 %vm303_vm1, %v809_v2  ;;  %806 = vmatprep.subr.msk.bf16.mxu1 %vm303_vm1, %v809_v2  ;;  %v827_v22 = vld [vmem:[%s1160_s0 + $0x48] sm:$0xff]   ;;  %v829_v23 = vld [vmem:[%s1160_s0 + $0xb8] sm:$0xff]   ;;  %v830_v24 = vld [vmem:[%s1160_s0 + $0x50] sm:$0xff]  }
   0x9   :  { %v832_v25 = vld [vmem:[%s1160_s0 + $0xc0] sm:$0xff]   ;;  %v831_v26 = vld [vmem:[%s1160_s0 + $0x58] sm:$0xff]   ;;  %v833_v27 = vld [vmem:[%s1160_s0 + $0xc8] sm:$0xff]  }
   0xa   :  { %v834_v28 = vld [vmem:[%s1160_s0 + $0x60] sm:$0xff]   ;;  %v835_v29 = vld [vmem:[%s1160_s0 + $0x68] sm:$0xff]  }
   0xb   :  { %746 = vmatpush3.bf16.msra.mxu0 %v305_v5  ;;  %804 = vmatpush3.bf16.msra.mxu1 %v305_v5  ;;  %v972_v46 = vld [vmem:[%s1161_s2] ss:$0 sm:$0xff] }
   0xe   :  { %748 = vmatmul.mubr.msk.bf16.vlgmr.msra.gmra.mrb[0].mxu0 %vm224_vm0, %v811_v6  ;;  %776 = vmatmul.mubr.msk.bf16.vlgmr.msra.gmra.mrb[0].mxu1 %vm224_vm0, %v813_v7 }
   0xf   :  { %751 = vmatprep.mubr.msk.bf16.mxu0 %vm224_vm0, %v814_v8  ;;  %779 = vmatprep.mubr.msk.bf16.mxu1 %vm224_vm0, %v816_v9 }
  0x16   :  { %752 = vmatmul.mubr.msk.bf16.gmra.mrb[4].mxu0 %vm224_vm0, %v815_v10  ;;  %780 = vmatmul.mubr.msk.bf16.gmra.mrb[4].mxu1 %vm224_vm0, %v817_v11 }
  0x17   :  { %755 = vmatprep.mubr.msk.bf16.mxu0 %vm224_vm0, %v818_v12  ;;  %783 = vmatprep.mubr.msk.bf16.mxu1 %vm224_vm0, %v820_v13 }
  0x1e   :  { %756 = vmatmul.mubr.msk.bf16.gmra.mrb[8].mxu0 %vm224_vm0, %v819_v14  ;;  %784 = vmatmul.mubr.msk.bf16.gmra.mrb[8].mxu1 %vm224_vm0, %v821_v15 }
  0x1f   :  { %759 = vmatprep.mubr.msk.bf16.mxu0 %vm224_vm0, %v822_v16  ;;  %787 = vmatprep.mubr.msk.bf16.mxu1 %vm224_vm0, %v824_v17 }
  0x26   :  { %760 = vmatmul.mubr.msk.bf16.gmra.mrb[12].mxu0 %vm224_vm0, %v823_v18  ;;  %788 = vmatmul.mubr.msk.bf16.gmra.mrb[12].mxu1 %vm224_vm0, %v825_v19 }
  0x27   :  { %763 = vmatprep.mubr.msk.bf16.mxu0 %vm224_vm0, %v826_v20  ;;  %791 = vmatprep.mubr.msk.bf16.mxu1 %vm224_vm0, %v828_v21 }
  0x2e   :  { %764 = vmatmul.mubr.msk.bf16.gmra.mrb[16].mxu0 %vm224_vm0, %v827_v22  ;;  %792 = vmatmul.mubr.msk.bf16.gmra.mrb[16].mxu1 %vm224_vm0, %v829_v23 }
  0x2f   :  { %767 = vmatprep.mubr.msk.bf16.mxu0 %vm224_vm0, %v830_v24  ;;  %795 = vmatprep.mubr.msk.bf16.mxu1 %vm224_vm0, %v832_v25 }
  0x36   :  { %768 = vmatmul.mubr.msk.bf16.gmra.mrb[20].mxu0 %vm224_vm0, %v831_v26  ;;  %796 = vmatmul.mubr.msk.bf16.gmra.mrb[20].mxu1 %vm224_vm0, %v833_v27 }
  0x37   :  { %771 = vmatprep.mubr.msk.bf16.mxu0 %vm224_vm0, %v834_v28 }
  0x3e   :  { %772 = vmatmul.mubr.msk.bf16.gmra.mrb[24].mxu0 %vm224_vm0, %v835_v29 }
  0xe1   :  { %v749_v30 = vpop.f32.mrb[0].mxu0  ;;  %v777_v31 = vpop.f32.mrb[0].mxu1 }
  0xe2   :  { %v341_v32 = vpop.f32.mrb[1].mxu0  ;;  %v453_v33 = vpop.f32.mrb[1].mxu1  ;;  %v350_v53 = vadd.f32 %v749_v30, %v972_v46  ;;  %v987_v57 = vadd.f32 %v777_v31, %v972_v46 }
  0xe3   :  { %v750_v34 = vpop.f32.mrb[2].mxu0  ;;  %v778_v35 = vpop.f32.mrb[2].mxu1  ;;  %v342_v56 = vadd.f32 %v972_v46, %v341_v32  ;;  %v454_v58 = vadd.f32 %v972_v46, %v453_v33 }
  0xe4   :  { %v344_v36 = vpop.f32.mrb[3].mxu0  ;;  %v456_v37 = vpop.f32.mrb[3].mxu1  ;;  %v991_v59 = vadd.f32 %v750_v34, %v972_v46  ;;  %v994_v60 = vadd.f32 %v778_v35, %v972_v46  ;;  %v550_v62 = vmax.f32 %v350_v53, 0.0  ;;  %v578_v0 = vmax.f32 %v987_v57, 0.0 }
  0xe5   :  { %v345_v61 = vadd.f32 %v972_v46, %v344_v36  ;;  %v548_v63 = vmax.f32 %v342_v56, 0.0  ;;  %v576_v1 = vmax.f32 %v454_v58, 0.0  ;;  %v999_v2 = vadd.f32 %v972_v46, %v456_v37 }
  0xe6   :  { %v551_v5 = vmax.f32 %v991_v59, 0.0  ;;  %v579_v7 = vmax.f32 %v994_v60, 0.0 }
  0xe7   :  { %v549_v11 = vmax.f32 %v345_v61, 0.0  ;;  %v577_v28 = vmax.f32 %v999_v2, 0.0 }
  0xe9   :  { %v753_v38 = vpop.f32.mrb[4].mxu0  ;;  %v781_v39 = vpop.f32.mrb[4].mxu1 }
  0xea   :  { %v357_v40 = vpop.f32.mrb[5].mxu0  ;;  %v469_v41 = vpop.f32.mrb[5].mxu1  ;;  %v1003_v6 = vadd.f32 %v753_v38, %v972_v46  ;;  %v1015_v13 = vadd.f32 %v781_v39, %v972_v46 }
  0xeb   :  { %v754_v42 = vpop.f32.mrb[6].mxu0  ;;  %v782_v43 = vpop.f32.mrb[6].mxu1  ;;  %v1012_v12 = vadd.f32 %v972_v46, %v357_v40  ;;  %v1018_v14 = vadd.f32 %v972_v46, %v469_v41 }
  0xec   :  { %v360_v44 = vpop.f32.mrb[7].mxu0  ;;  %v472_v45 = vpop.f32.mrb[7].mxu1  ;;  %v1021_v17 = vadd.f32 %v754_v42, %v972_v46  ;;  %v1024_v18 = vadd.f32 %v782_v43, %v972_v46  ;;  %v554_v27 = vmax.f32 %v1003_v6, 0.0  ;;  %v582_v32 = vmax.f32 %v1015_v13, 0.0 }
  0xed   :  { %v361_v23 = vadd.f32 %v972_v46, %v360_v44  ;;  %v1029_v24 = vadd.f32 %v972_v46, %v472_v45  ;;  %v552_v31 = vmax.f32 %v1012_v12, 0.0  ;;  %v580_v33 = vmax.f32 %v1018_v14, 0.0 }
  0xee   :  { %v555_v35 = vmax.f32 %v1021_v17, 0.0  ;;  %v583_v40 = vmax.f32 %v1024_v18, 0.0 }
  0xef   :  { %v553_v39 = vmax.f32 %v361_v23, 0.0  ;;  %v581_v41 = vmax.f32 %v1029_v24, 0.0 }
  0xf1   :  { %v757_v47 = vpop.f32.mrb[8].mxu0  ;;  %v785_v48 = vpop.f32.mrb[8].mxu1 }
  0xf2   :  { %v373_v49 = vpop.f32.mrb[9].mxu0  ;;  %v974_v50 = vpop.f32.mrb[9].mxu1  ;;  %v1042_v36 = vadd.f32 %v757_v47, %v972_v46  ;;  %v1052_v53 = vadd.f32 %v785_v48, %v972_v46 }
  0xf3   :  { %v976_v51 = vpop.f32.mrb[10].mxu0  ;;  %v978_v52 = vpop.f32.mrb[10].mxu1  ;;  %v1049_v45 = vadd.f32 %v972_v46, %v373_v49 }
  0xf4   :  { %v981_v54 = vpop.f32.mrb[11].mxu0  ;;  %v983_v55 = vpop.f32.mrb[11].mxu1  ;;  %v558_v48 = vmax.f32 %v1042_v36, 0.0 }
  0xf9   :  { %v761_v3 = vpop.f32.mrb[12].mxu0  ;;  %v789_v4 = vpop.f32.mrb[12].mxu1 }
  0xfa   :  { %v398_v8 = vadd.f32 %v761_v3, %v972_v46  ;;  %v1007_v9 = vpop.f32.mrb[13].mxu0  ;;  %v1009_v10 = vpop.f32.mrb[13].mxu1 }
  0xfb   :  { %v762_v15 = vpop.f32.mrb[14].mxu0  ;;  %v790_v16 = vpop.f32.mrb[14].mxu1  ;;  %v502_v24 = vadd.f32 %v972_v46, %v1009_v10 }
  0xfc   :  { %v562_v19 = vmax.f32 %v398_v8, 0.0  ;;  %v401_v20 = vadd.f32 %v762_v15, %v972_v46  ;;  %v392_v21 = vpop.f32.mrb[15].mxu0  ;;  %v504_v22 = vpop.f32.mrb[15].mxu1 }
  0xfd   :  { %v393_v25 = vadd.f32 %v972_v46, %v392_v21  ;;  %v505_v26 = vadd.f32 %v972_v46, %v504_v22 }
  0xfe   :  { %v1035_v29 = vmax.f32 %v549_v11, %v562_v19  ;;  %v563_v30 = vmax.f32 %v401_v20, 0.0 }
  0xff   :  { %v561_v34 = vmax.f32 %v393_v25, 0.0  ;;  %v589_v38 = vmax.f32 %v505_v26, 0.0  ;;  %v1076_v25 = vadd.f32 %v978_v52, %v972_v46 }
 0x100   :  { %v602_v37 = vmax.f32 %v550_v62, %v563_v30  ;;  %v1057_v62 = vadd.f32 %v972_v46, %v974_v50  ;;  %v1066_v50 = vadd.f32 %v976_v51, %v972_v46  ;;  %v377_v30 = vadd.f32 %v972_v46, %v981_v54 }
 0x101   :  { %v1046_v42 = vmax.f32 %v548_v63, %v561_v34  ;;  %v765_v43 = vpop.f32.mrb[16].mxu0  ;;  %v793_v44 = vpop.f32.mrb[16].mxu1  ;;  %v510_v63 = vadd.f32 %v789_v4, %v972_v46  ;;  %v513_v4 = vadd.f32 %v790_v16, %v972_v46  ;;  %v587_v13 = vmax.f32 %v1076_v25, 0.0 }
 0x102   :  { %v615_v56 = vmax.f32 %v602_v37, %v576_v1  ;;  %v414_v47 = vadd.f32 %v765_v43, %v972_v46  ;;  %v405_v58 = vpop.f32.mrb[17].mxu0  ;;  %v517_v61 = vpop.f32.mrb[17].mxu1 }
 0x103   :  { %v406_v2 = vadd.f32 %v972_v46, %v405_v58  ;;  %v766_v3 = vpop.f32.mrb[18].mxu0  ;;  %v518_v49 = vadd.f32 %v972_v46, %v517_v61  ;;  %v794_v6 = vpop.f32.mrb[18].mxu1  ;;  %v590_v51 = vmax.f32 %v510_v63, 0.0  ;;  %v591_v43 = vmax.f32 %v513_v4, 0.0 }
 0x104   :  { %v628_v8 = vmax.f32 %v615_v56, %v589_v38  ;;  %v566_v1 = vmax.f32 %v414_v47, 0.0  ;;  %v417_v11 = vadd.f32 %v766_v3, %v972_v46  ;;  %v408_v12 = vpop.f32.mrb[19].mxu0  ;;  %v520_v14 = vpop.f32.mrb[19].mxu1  ;;  %v526_v61 = vadd.f32 %v793_v44, %v972_v46 }
 0x105   :  { %v564_v15 = vmax.f32 %v406_v2, 0.0  ;;  %v409_v19 = vadd.f32 %v972_v46, %v408_v12  ;;  %v592_v22 = vmax.f32 %v518_v49, 0.0  ;;  %v521_v23 = vadd.f32 %v972_v46, %v520_v14 }
 0x106   :  { %641 = vst [vmem:[%s1162_s3 + $0x10] sm:$0xff] %v628_v8  ;;  %v605_v20 = vmax.f32 %v553_v39, %v566_v1  ;;  %v567_v21 = vmax.f32 %v417_v11, 0.0  ;;  %v556_v39 = vmax.f32 %v1049_v45, 0.0  ;;  %v557_v3 = vmax.f32 %v377_v30, 0.0 }
 0x107   :  { %v603_v16 = vmax.f32 %v551_v5, %v564_v15  ;;  %v565_v26 = vmax.f32 %v409_v19, 0.0  ;;  %v593_v38 = vmax.f32 %v521_v23, 0.0  ;;  %v489_v23 = vadd.f32 %v972_v46, %v983_v55 }
 0x108   :  { %v606_v34 = vmax.f32 %v554_v27, %v567_v21  ;;  %v618_v37 = vmax.f32 %v605_v20, %v579_v7  ;;  %v584_v20 = vmax.f32 %v1057_v62, 0.0  ;;  %v594_v21 = vmax.f32 %v526_v61, 0.0 }
 0x109   :  { %v616_v56 = vmax.f32 %v603_v16, %v577_v28  ;;  %v604_v47 = vmax.f32 %v552_v31, %v565_v26  ;;  %v769_v52 = vpop.f32.mrb[20].mxu0  ;;  %v797_v58 = vpop.f32.mrb[20].mxu1  ;;  %v559_v62 = vmax.f32 %v1066_v50, 0.0  ;;  %v390_v30 = vadd.f32 %v972_v46, %v1007_v9 }
 0x10a   :  { %v631_v59 = vmax.f32 %v618_v37, %v592_v22  ;;  %v619_v5 = vmax.f32 %v606_v34, %v580_v33  ;;  %v430_v63 = vadd.f32 %v769_v52, %v972_v46  ;;  %v421_v2 = vpop.f32.mrb[21].mxu0  ;;  %v533_v54 = vpop.f32.mrb[21].mxu1  ;;  %v585_v61 = vmax.f32 %v489_v23, 0.0 }
 0x10b   :  { %v629_v27 = vmax.f32 %v616_v56, %v590_v51  ;;  %v617_v60 = vmax.f32 %v604_v47, %v578_v0  ;;  %v422_v7 = vadd.f32 %v972_v46, %v421_v2  ;;  %v770_v45 = vpop.f32.mrb[22].mxu0  ;;  %v534_v28 = vadd.f32 %v972_v46, %v533_v54  ;;  %v798_v31 = vpop.f32.mrb[22].mxu1 }
 0x10c   :  { %644 = vst [vmem:[%s1162_s3 + $0x28] sm:$0xff] %v631_v59  ;;  %v632_v33 = vmax.f32 %v619_v5, %v593_v38  ;;  %v570_v44 = vmax.f32 %v430_v63, 0.0  ;;  %v433_v49 = vadd.f32 %v770_v45, %v972_v46  ;;  %v424_v8 = vpop.f32.mrb[23].mxu0  ;;  %v536_v1 = vpop.f32.mrb[23].mxu1  ;;  %v529_v0 = vadd.f32 %v794_v6, %v972_v46 }
 0x10d   :  { %642 = vst [vmem:[%s1162_s3 + $0x18] sm:$0xff] %v629_v27  ;;  %v630_v57 = vmax.f32 %v617_v60, %v591_v43  ;;  %v568_v11 = vmax.f32 %v422_v7, 0.0  ;;  %v425_v12 = vadd.f32 %v972_v46, %v424_v8  ;;  %v596_v15 = vmax.f32 %v534_v28, 0.0 }
 0x10e   :  { %645 = vst [vmem:[%s1162_s3 + $0x30] sm:$0xff] %v632_v33  ;;  %v609_v14 = vmax.f32 %v557_v3, %v570_v44  ;;  %v571_v4 = vmax.f32 %v433_v49, 0.0  ;;  %v537_v19 = vadd.f32 %v972_v46, %v536_v1  ;;  %v595_v37 = vmax.f32 %v529_v0, 0.0 }
 0x10f   :  { %643 = vst [vmem:[%s1162_s3 + $0x20] sm:$0xff] %v630_v57  ;;  %v607_v6 = vmax.f32 %v555_v35, %v568_v11  ;;  %v569_v22 = vmax.f32 %v425_v12, 0.0  ;;  %v560_v10 = vmax.f32 %v390_v30, 0.0  ;;  %v545_v63 = vadd.f32 %v798_v31, %v972_v46 }
 0x110   :  { %v610_v51 = vmax.f32 %v558_v48, %v571_v4  ;;  %v622_v16 = vmax.f32 %v609_v14, %v583_v40  ;;  %v597_v26 = vmax.f32 %v537_v19, 0.0  ;;  %v542_v40 = vadd.f32 %v797_v58, %v972_v46 }
 0x111   :  { %v620_v17 = vmax.f32 %v607_v6, %v581_v41  ;;  %v608_v35 = vmax.f32 %v556_v39, %v569_v22  ;;  %v773_v34 = vpop.f32.mrb[24].mxu0  ;;  %v588_v27 = vmax.f32 %v502_v24, 0.0  ;;  %v586_v45 = vmax.f32 %v1052_v53, 0.0 }
 0x112   :  { %v635_v38 = vmax.f32 %v622_v16, %v596_v15  ;;  %v623_v55 = vmax.f32 %v610_v51, %v584_v20  ;;  %v446_v36 = vadd.f32 %v773_v34, %v972_v46  ;;  %v437_v48 = vpop.f32.mrb[25].mxu0  ;;  %v598_v25 = vmax.f32 %v542_v40, 0.0 }
 0x113   :  { %v633_v43 = vmax.f32 %v620_v17, %v594_v21  ;;  %v621_v18 = vmax.f32 %v608_v35, %v582_v32  ;;  %v438_v50 = vadd.f32 %v972_v46, %v437_v48  ;;  %v774_v9 = vpop.f32.mrb[26].mxu0  ;;  %v599_v33 = vmax.f32 %v545_v63, 0.0 }
 0x114   :  { %648 = vst [vmem:[%s1162_s3 + $0x48] sm:$0xff] %v635_v38  ;;  %v636_v41 = vmax.f32 %v623_v55, %v597_v26  ;;  %v574_v39 = vmax.f32 %v446_v36, 0.0  ;;  %v449_v56 = vadd.f32 %v774_v9, %v972_v46  ;;  %v440_v47 = vpop.f32.mrb[27].mxu0 }
 0x115   :  { %646 = vst [vmem:[%s1162_s3 + $0x38] sm:$0xff] %v633_v43  ;;  %v634_v32 = vmax.f32 %v621_v18, %v595_v37  ;;  %v572_v52 = vmax.f32 %v438_v50, 0.0  ;;  %v441_v58 = vadd.f32 %v972_v46, %v440_v47 }
 0x116   :  { %649 = vst [vmem:[%s1162_s3 + $0x50] sm:$0xff] %v636_v41  ;;  %v613_v59 = vmax.f32 %v1046_v42, %v574_v39  ;;  %v575_v5 = vmax.f32 %v449_v56, 0.0 }
 0x117   :  { %647 = vst [vmem:[%s1162_s3 + $0x40] sm:$0xff] %v634_v32  ;;  %v611_v2 = vmax.f32 %v559_v62, %v572_v52  ;;  %v573_v54 = vmax.f32 %v441_v58, 0.0 }
 0x118   :  { %v626_v60 = vmax.f32 %v613_v59, %v587_v13  ;;  %v614_v7 = vmax.f32 %v1035_v29, %v575_v5 }
 0x119   :  { %v624_v28 = vmax.f32 %v611_v2, %v585_v61  ;;  %v612_v3 = vmax.f32 %v560_v10, %v573_v54 }
 0x11a   :  { %639 = vst [vmem:[%s1162_s3] sm:$0xff] %v626_v60  ;;  %v627_v42 = vmax.f32 %v614_v7, %v588_v27 }
 0x11b   :  { %v637_v44 = vmax.f32 %v624_v28, %v598_v25  ;;  %v625_v49 = vmax.f32 %v612_v3, %v586_v45 }
 0x11c   :  { %640 = vst [vmem:[%s1162_s3 + $0x8] sm:$0xff] %v627_v42 }
 0x11d   :  { %650 = vst [vmem:[%s1162_s3 + $0x58] sm:$0xff] %v637_v44  ;;  %v638_v46 = vmax.f32 %v625_v49, %v599_v33 }
 0x11f   :  { %651 = vst [vmem:[%s1162_s3 + $0x60] sm:$0xff] %v638_v46 }

// kernel: _lambda_.3
= control target key start
LH: loop header
LB: loop body
LE: loop exit
PB: predicated region body
PF: predicated region fallthrough
CT: control target
= control target key end

     0   :  { %v576_v0 = vmov 0   ;;  %vm239_vm0 = vcmask 64512   ;;  %vm243_vm1 = vcmask 1043456   ;;  %v577_v33 = vmov 0.0   ;;  %s732_s1 = inlined_call_operand.vmem [shape: bf16[392,128], index: 1, kind: input, shape index: {}]   ;;  %s733_s0 = inlined_call_operand.vmem [shape: bf16[8,392], index: 0, kind: input, shape index: {}]   ;;  %s734_s3 = inlined_call_operand.vmem [shape: bf16[128,128], index: 3, kind: input, shape index: {}]   ;;  %s735_s2 = inlined_call_operand.vmem [shape: f32[1,128], index: 2, kind: input, shape index: {}]   ;;  %s736_s4 = inlined_call_operand.vmem [shape: f32[1,128], index: 4, kind: input, shape index: {}]   ;;  %s737_s5 = inlined_call_operand.vmem [shape: f32[8,128], index: 5, kind: output, shape index: {}]  }
   0x1   :  { %287 = vmatprep.subr.bf16.mxu1 %v576_v0  ;;  %v539_v1 = vld [vmem:[%s732_s1 + $0x40] sm:$0xff]   ;;  %v542_v4 = vld [vmem:[%s732_s1 + $0x48] sm:$0xff]   ;;  %v545_v7 = vld [vmem:[%s732_s1 + $0x50] sm:$0xff]   ;;  %vm578_vm2 = vmmov 0  }
   0x2   :  { %v540_v2 = vld [vmem:[%s732_s1 + $0x80] sm:$0xff]   ;;  %485 = vmatprep.subr.bf16.mxu0 %v539_v1  ;;  %v543_v5 = vld [vmem:[%s732_s1 + $0x88] sm:$0xff]   ;;  %v546_v8 = vld [vmem:[%s732_s1 + $0x90] sm:$0xff]  }
   0x3   :  { %v541_v3 = vld [vmem:[%s732_s1] sm:$0xff]   ;;  %288 = vmatpush1.bf16.msra.mxu1 %v540_v2  ;;  %v544_v6 = vld [vmem:[%s732_s1 + $0x8] sm:$0xff]   ;;  %v547_v9 = vld [vmem:[%s732_s1 + $0x10] sm:$0xff]  }
   0x4   :  { %486 = vmatpush3.bf16.msra.mxu0 %v541_v3  ;;  %289 = vmatprep.subr.bf16.mxu1 %v576_v0  ;;  %v548_v10 = vld [vmem:[%s732_s1 + $0x58] sm:$0xff]   ;;  %v551_v13 = vld [vmem:[%s732_s1 + $0x60] sm:$0xff]   ;;  %v554_v16 = vld [vmem:[%s732_s1 + $0x68] sm:$0xff]  }
   0x5   :  { %487 = vmatprep.subr.bf16.mxu0 %v542_v4  ;;  %v549_v11 = vld [vmem:[%s732_s1 + $0x98] sm:$0xff]   ;;  %v552_v14 = vld [vmem:[%s732_s1 + $0xa0] sm:$0xff]   ;;  %v555_v17 = vld [vmem:[%s732_s1 + $0xa8] sm:$0xff]  }
   0x6   :  { %v550_v12 = vld [vmem:[%s732_s1 + $0x18] sm:$0xff]   ;;  %v553_v15 = vld [vmem:[%s732_s1 + $0x20] sm:$0xff]   ;;  %v556_v18 = vld [vmem:[%s732_s1 + $0x28] sm:$0xff]  }
   0x7   :  { %290 = vmatpush1.bf16.msra.mxu1 %v543_v5  ;;  %v557_v19 = vld [vmem:[%s732_s1 + $0x70] sm:$0xff]   ;;  %v560_v22 = vld [vmem:[%s732_s1 + $0x78] sm:$0xff]   ;;  %v21_v23 = vld [vmem:[%s733_s0] sm:$0xff] }
   0x8   :  { %488 = vmatpush3.bf16.msra.mxu0 %v544_v6  ;;  %291 = vmatprep.subr.bf16.mxu1 %v576_v0  ;;  %v558_v20 = vld [vmem:[%s732_s1 + $0xb0] sm:$0xff]   ;;  %v447_v24 = vcombine.high %v21_v23, %v21_v23  ;;  %v22_v25 = vld [vmem:[%s733_s0 + $0x8] sm:$0xff]  ;;  %v561_v26 = vld [vmem:[%s732_s1 + $0xb8] sm:$0xff]   ;;  %v446_v30 = vcombine.low %v21_v23, %v21_v23 }
   0x9   :  { %489 = vmatprep.subr.bf16.mxu0 %v545_v7  ;;  %v559_v21 = vld [vmem:[%s732_s1 + $0x30] sm:$0xff]   ;;  %v449_v27 = vcombine.high %v22_v25, %v22_v25  ;;  %v562_v28 = vld [vmem:[%s732_s1 + $0x38] sm:$0xff]   ;;  %v565_v29 = vld [vmem:[%s732_s1 + $0xc0] ss:$0 sps:$4 sm:$0xff]   ;;  %v448_v34 = vcombine.low %v22_v25, %v22_v25 }
   0xa   :  { %279 = vmatprep.mubr.bf16.mxu0 %v447_v24  ;;  %v245_v31 = vsel %vm243_vm1, %v565_v29, 0  ;;  %v568_v32 = vld [vmem:[%s734_s3] sm:$0xff]   ;;  %v569_v35 = vld [vmem:[%s734_s3 + $0x8] sm:$0xff]   ;;  %v570_v36 = vld [vmem:[%s734_s3 + $0x10] sm:$0xff]  }
   0xb   :  { %292 = vmatpush1.bf16.msra.mxu1 %v546_v8  ;;  %475 = vmatprep.mubr.msk.bf16.mxu1 %vm239_vm0, %v449_v27  ;;  %v571_v37 = vld [vmem:[%s734_s3 + $0x18] sm:$0xff]   ;;  %v572_v38 = vld [vmem:[%s734_s3 + $0x20] sm:$0xff]   ;;  %v573_v39 = vld [vmem:[%s734_s3 + $0x28] sm:$0xff]  }
   0xc   :  { %490 = vmatpush3.bf16.msra.mxu0 %v547_v9  ;;  %293 = vmatprep.subr.bf16.mxu1 %v576_v0  ;;  %v574_v40 = vld [vmem:[%s734_s3 + $0x30] sm:$0xff]   ;;  %v575_v41 = vld [vmem:[%s734_s3 + $0x38] sm:$0xff]   ;;  %v445_v44 = vld [vmem:[%s735_s2] ss:$0 sm:$0xff] }
   0xd   :  { %491 = vmatprep.subr.bf16.mxu0 %v548_v10  ;;  %v476_v56 = vld [vmem:[%s736_s4] ss:$0 sm:$0xff] }
   0xf   :  { %294 = vmatpush1.bf16.msra.mxu1 %v549_v11 }
  0x10   :  { %492 = vmatpush3.bf16.msra.mxu0 %v550_v12  ;;  %295 = vmatprep.subr.bf16.mxu1 %v576_v0 }
  0x11   :  { %493 = vmatprep.subr.bf16.mxu0 %v551_v13 }
  0x13   :  { %296 = vmatpush1.bf16.msra.mxu1 %v552_v14 }
  0x14   :  { %494 = vmatpush3.bf16.msra.mxu0 %v553_v15  ;;  %297 = vmatprep.subr.bf16.mxu1 %v576_v0 }
  0x15   :  { %495 = vmatprep.subr.bf16.mxu0 %v554_v16 }
  0x17   :  { %298 = vmatpush1.bf16.msra.mxu1 %v555_v17 }
  0x18   :  { %496 = vmatpush3.bf16.msra.mxu0 %v556_v18  ;;  %299 = vmatprep.subr.bf16.mxu1 %v576_v0 }
  0x19   :  { %497 = vmatprep.subr.bf16.mxu0 %v557_v19 }
  0x1b   :  { %300 = vmatpush1.bf16.msra.mxu1 %v558_v20 }
  0x1c   :  { %498 = vmatpush3.bf16.msra.mxu0 %v559_v21  ;;  %301 = vmatprep.subr.bf16.mxu1 %v576_v0 }
  0x1d   :  { %499 = vmatprep.subr.bf16.mxu0 %v560_v22 }
  0x1f   :  { %302 = vmatpush1.bf16.msra.mxu1 %v561_v26 }
  0x20   :  { %500 = vmatpush3.bf16.msra.mxu0 %v562_v28  ;;  %303 = vmatprep.subr.bf16.mxu1 %v576_v0 }
  0x21   :  { %516 = vmatprep.subr.bf16.mxu0 %v577_v33 }
  0x23   :  { %280 = vmatmul.mubr.bf16.vlgmr.msra.gmra.mrb[0].mxu0 %v446_v30  ;;  %304 = vmatpush1.bf16.msra.mxu1 %v245_v31 }
  0x24   :  { %517 = vmatpush3.bf16.msra.mxu0 %v568_v32  ;;  %532 = vmatprep.mubr.msk.bf16.mxu0 %vm578_vm2, %v577_v33 }
  0x25   :  { %518 = vmatprep.subr.bf16.mxu0 %v577_v33 }
  0x26   :  { %320 = vmatmul.mubr.bf16.vlgmr.msra.gmra.mrb[0].mxu1 %v448_v34 }
  0x28   :  { %519 = vmatpush3.bf16.msra.mxu0 %v569_v35 }
  0x29   :  { %520 = vmatprep.subr.bf16.mxu0 %v577_v33 }
  0x2c   :  { %521 = vmatpush3.bf16.msra.mxu0 %v570_v36 }
  0x2d   :  { %522 = vmatprep.subr.bf16.mxu0 %v577_v33 }
  0x30   :  { %523 = vmatpush3.bf16.msra.mxu0 %v571_v37 }
  0x31   :  { %524 = vmatprep.subr.bf16.mxu0 %v577_v33 }
  0x34   :  { %525 = vmatpush3.bf16.msra.mxu0 %v572_v38 }
  0x35   :  { %526 = vmatprep.subr.bf16.mxu0 %v577_v33 }
  0x38   :  { %527 = vmatpush3.bf16.msra.mxu0 %v573_v39 }
  0x39   :  { %528 = vmatprep.subr.bf16.mxu0 %v577_v33 }
  0x3c   :  { %529 = vmatpush3.bf16.msra.mxu0 %v574_v40 }
  0x3d   :  { %530 = vmatprep.subr.bf16.mxu0 %v577_v33 }
  0x40   :  { %531 = vmatpush3.bf16.msra.mxu0 %v575_v41 }
  0xf6   :  { %v501_v42 = vpop.f32.mrb[0].mxu0 }
  0xf7   :  { %v502_v43 = vpop.f32.mrb[1].mxu0 }
  0xf8   :  { %v503_v45 = vadd.f32 %v502_v43, %v501_v42  ;;  %v504_v46 = vpop.f32.mrb[2].mxu0 }
  0xf9   :  { %v505_v47 = vpop.f32.mrb[3].mxu0  ;;  %v321_v48 = vpop.f32.mrb[0].mxu1 }
  0xfa   :  { %v282_v49 = vadd.f32 %v503_v45, %v445_v44  ;;  %v323_v50 = vpop.f32.mrb[1].mxu1 }
  0xfb   :  { %v324_v51 = vpop.f32.mrb[2].mxu1 }
  0xfc   :  { %v322_v52 = vadd.f32 %v321_v48, %v282_v49  ;;  %v325_v53 = vpop.f32.mrb[3].mxu1 }
  0xfe   :  { %v327_v54 = vmax.f32 %v322_v52, 0.0 }
 0x100   :  { %v328_v55 = vpack.c.bf16 %v327_v54, %v327_v54 }
 0x102   :  { %533 = vmatmul.mubr.bf16.vlgmr.msra.gmra.mrb[4].mxu0 %v328_v55 }
 0x1d5   :  { %v434_v57 = vpop.f32.mrb[4].mxu0 }
 0x1d6   :  { %v435_v58 = vadd.f32 %v476_v56, %v434_v57  ;;  %v534_v59 = vpop.f32.mrb[5].mxu0 }
 0x1d7   :  { %v437_v60 = vpop.f32.mrb[6].mxu0 }
 0x1d8   :  { %440 = vst [vmem:[%s737_s5] sm:$0xff] %v435_v58  ;;  %v535_v61 = vpop.f32.mrb[7].mxu0 }

</bundles_post_ra>
